<compile_context>
chip_gen: v6e
topology: v6e:2x2x1
jax: 0.10.0
libtpu: 0.0.40
codegen_flags: <defaults>
</compile_context>

<pallas_src>
import jax
import jax.numpy as jnp
from jax import lax
from jax.experimental import pallas as pl
from jax.experimental.pallas import tpu as pltpu

IN_DIM = 28 * 28   # 784, fed unpadded (equals full array dim in the BlockSpec)
H_PAD = 128        # hidden width 18 padded up to 128
OUT_ROWS = 8       # sublane-dense output block height; row 0 is the real logit


def _discriminator_kernel(x_ref, w1_ref, b1_ref, w2_ref, b2_ref,
                          w3_ref, b3_ref, w4t_ref, b4_ref, o_ref):
    # x_ref: (bt, 784) f32; w1: (784,128) bf16; w2/w3: (128,128) bf16;
    # b1-3: (1,128) f32; w4t: (8,128) bf16; b4: (8,1) f32; o_ref: (8, bt) f32.
    x = x_ref[...].astype(jnp.bfloat16)            # cast in VMEM, not in HBM

    h = jnp.dot(x, w1_ref[...], preferred_element_type=jnp.float32) + b1_ref[...]
    h = jnp.maximum(h, 0.0).astype(jnp.bfloat16)

    h = jnp.dot(h, w2_ref[...], preferred_element_type=jnp.float32) + b2_ref[...]
    h = jnp.maximum(h, 0.0).astype(jnp.bfloat16)

    h = jnp.dot(h, w3_ref[...], preferred_element_type=jnp.float32) + b3_ref[...]
    h = jnp.maximum(h, 0.0).astype(jnp.bfloat16)

    # Final layer as an NT matmul: (8,128) . (bt,128)^T -> (8, bt).
    # Only row 0 of w4t is real, so only row 0 of the result is meaningful;
    # the block stays lane-dense along the batch and only 8 sublanes tall.
    logits = lax.dot_general(
        w4t_ref[...], h,
        dimension_numbers=(((1,), (1,)), ((), ())),
        preferred_element_type=jnp.float32) + b4_ref[...]

    # Sigmoid on the tiny (8, bt) block only (exp on the EUP).
    o_ref[...] = pl.reciprocal(1.0 + jnp.exp(-logits), approx=False)


def _pad_to(a, shape):
    return jnp.pad(a, [(0, s - d) for d, s in zip(a.shape, shape)])


def prepare_padded_params(params):
    """Zero-pad weights/biases to lane-dense shapes; weights bf16, biases f32.

    Padding is exact: padded bias lanes are 0 and ReLU(0)=0, padded weight
    rows are 0, so padded lanes contribute nothing to real outputs.
    """
    (w1, b1), (w2, b2), (w3, b3), (w4, b4) = params
    w1p = _pad_to(w1, (IN_DIM, H_PAD)).astype(jnp.bfloat16)
    w2p = _pad_to(w2, (H_PAD, H_PAD)).astype(jnp.bfloat16)
    w3p = _pad_to(w3, (H_PAD, H_PAD)).astype(jnp.bfloat16)
    # final layer stored transposed: (18,1) -> (1,18) -> (8,128); row 0 real
    w4t = _pad_to(w4.T, (OUT_ROWS, H_PAD)).astype(jnp.bfloat16)
    b1p = _pad_to(b1, (1, H_PAD)).astype(jnp.float32)
    b2p = _pad_to(b2, (1, H_PAD)).astype(jnp.float32)
    b3p = _pad_to(b3, (1, H_PAD)).astype(jnp.float32)
    b4p = _pad_to(b4.reshape(1, 1), (OUT_ROWS, 1)).astype(jnp.float32)
    return (w1p, b1p, w2p, b2p, w3p, b3p, w4t, b4p)


def _round_up(x, m):
    return (x + m - 1) // m * m


def _choose_batch_tile(B):
    full = _round_up(B, 16)            # bf16 sublane-packing friendly
    if full <= 128:
        return full                    # single grid step; block == padded batch
    # Multi-step grid: the (8, bt) output block needs bt % 128 == 0.
    # Aim for >= 2 steps so v7x can shard the batch across both TensorCores;
    # cap at 1024 rows (~3.2 MB f32 x-tile) to stay comfortably inside VMEM
    # on all generations while hitting ~86% of HBM roofline.
    return min(1024, _round_up(pl.cdiv(B, 2), 128))


def discriminator_forward(x_nchw, params):
    """Pallas equivalent of Discriminator.forward.

    x_nchw: (B, 1, 28, 28) float32
    returns: (B,) float32 (matches sigmoid(X.squeeze()) for B > 1)
    """
    B = x_nchw.shape[0]
    x_flat = x_nchw.reshape(B, IN_DIM).astype(jnp.float32)   # nn.Flatten (glue)

    bt = _choose_batch_tile(B)
    b_pad = _round_up(B, bt)
    if b_pad != B:                         # pad batch rows only when needed
        x_flat = jnp.pad(x_flat, ((0, b_pad - B), (0, 0)))

    w1p, b1p, w2p, b2p, w3p, b3p, w4t, b4p = prepare_padded_params(params)

    def resident(shape):
        # full-array block, same block every grid step -> stays in VMEM
        return pl.BlockSpec(shape, lambda i: tuple(0 for _ in shape))

    out = pl.pallas_call(
        _discriminator_kernel,
        out_shape=jax.ShapeDtypeStruct((OUT_ROWS, b_pad), jnp.float32),
        grid=(b_pad // bt,),
        in_specs=[
            # x tile, pipelined; last dim == full dim so 784 needs no padding
            pl.BlockSpec((bt, IN_DIM), lambda i: (i, 0)),
            resident(w1p.shape), resident(b1p.shape),
            resident(w2p.shape), resident(b2p.shape),
            resident(w3p.shape), resident(b3p.shape),
            resident(w4t.shape), resident(b4p.shape),
        ],
        # lane-dense (8, bt) column slab per step; row 0 holds the real prob
        out_specs=pl.BlockSpec((OUT_ROWS, bt), lambda i: (0, i)),
        compiler_params=pltpu.CompilerParams(
            dimension_semantics=("parallel",),       # megacore sharding on v7x
            vmem_limit_bytes=32 * 1024 * 1024),
    )(x_flat, w1p, b1p, w2p, b2p, w3p, b3p, w4t, b4p)

    # Row 0 holds the real probabilities; drop batch padding.
    # TODO(synk): for B == 1 torch's X.squeeze() is 0-d; we return shape (1,).
    return out[0, :B]


def init_params(key):
    """Deterministic init mimicking nn.Linear's default U(-1/sqrt(fan_in), +)."""
    dims = [(IN_DIM, 18), (18, 18), (18, 18), (18, 1)]
    params = []
    for (fan_in, fan_out) in dims:
        key, kw, kb = jax.random.split(key, 3)
        bound = 1.0 / jnp.sqrt(jnp.float32(fan_in))
        # store W already transposed to (in, out) so kernel does x @ W
        w = jax.random.uniform(kw, (fan_in, fan_out), jnp.float32, -bound, bound)
        b = jax.random.uniform(kb, (1, fan_out), jnp.float32, -bound, bound)
        params.append((w, b))
    return params


def reference_forward(x_nchw, params):
    """Pure-JAX f32 reference for correctness check."""
    B = x_nchw.shape[0]
    h = x_nchw.reshape(B, IN_DIM).astype(jnp.float32)
    (w1, b1), (w2, b2), (w3, b3), (w4, b4) = params
    h = jnp.maximum(h @ w1 + b1, 0.0)
    h = jnp.maximum(h @ w2 + b2, 0.0)
    h = jnp.maximum(h @ w3 + b3, 0.0)
    logits = h @ w4 + b4
    return jax.nn.sigmoid(logits[:, 0])


if __name__ == "__main__":
    key = jax.random.PRNGKey(0)
    key, kx = jax.random.split(key)

    B = 8
    x = jax.random.normal(kx, (B, 1, 28, 28), jnp.float32)
    params = init_params(key)

    out = discriminator_forward(x, params)
    out = jax.block_until_ready(out)

    ref = reference_forward(x, params)
    assert out.shape == (B,), out.shape
    # bf16 MXU weights bound accuracy => compare with a bf16-level tolerance.
    assert jnp.allclose(out, ref, atol=2e-2, rtol=2e-2), (out, ref)

    print("KERNEL_OK")
</pallas_src>

<mosaic_0001>
module attributes {stable_mosaic.version = 11 : i64} {
  func.func @_discriminator_kernel(%arg0: i32, %arg1: memref<16x784xf32, #tpu.memory_space<vmem>>, %arg2: memref<784x128xbf16, #tpu.memory_space<vmem>>, %arg3: memref<1x128xf32, #tpu.memory_space<vmem>>, %arg4: memref<128x128xbf16, #tpu.memory_space<vmem>>, %arg5: memref<1x128xf32, #tpu.memory_space<vmem>>, %arg6: memref<128x128xbf16, #tpu.memory_space<vmem>>, %arg7: memref<1x128xf32, #tpu.memory_space<vmem>>, %arg8: memref<8x128xbf16, #tpu.memory_space<vmem>>, %arg9: memref<8x1xf32, #tpu.memory_space<vmem>>, %arg10: memref<8x16xf32, #tpu.memory_space<vmem>>) attributes {dimension_semantics = [#tpu.dimension_semantics<parallel>], iteration_bounds = array<i64: 1>, scalar_prefetch = 0 : i64, scratch_operands = 0 : i64, tpu.core_type = #tpu.core_type<tc>, window_params = [{transform_indices = @transform_0, window_bounds = array<i64: 16, 784>}, {pipeline_mode = #tpu.pipeline_mode<synchronous>, transform_indices = @transform_1, window_bounds = array<i64: 784, 128>}, {pipeline_mode = #tpu.pipeline_mode<synchronous>, transform_indices = @transform_2, window_bounds = array<i64: 1, 128>}, {pipeline_mode = #tpu.pipeline_mode<synchronous>, transform_indices = @transform_3, window_bounds = array<i64: 128, 128>}, {pipeline_mode = #tpu.pipeline_mode<synchronous>, transform_indices = @transform_4, window_bounds = array<i64: 1, 128>}, {pipeline_mode = #tpu.pipeline_mode<synchronous>, transform_indices = @transform_5, window_bounds = array<i64: 128, 128>}, {pipeline_mode = #tpu.pipeline_mode<synchronous>, transform_indices = @transform_6, window_bounds = array<i64: 1, 128>}, {pipeline_mode = #tpu.pipeline_mode<synchronous>, transform_indices = @transform_7, window_bounds = array<i64: 8, 128>}, {pipeline_mode = #tpu.pipeline_mode<synchronous>, transform_indices = @transform_8, window_bounds = array<i64: 8, 1>}, {transform_indices = @transform_9, window_bounds = array<i64: 8, 16>}]} {
    %c0 = arith.constant 0 : index
    %c0_0 = arith.constant 0 : index
    %0 = vector.load %arg1[%c0, %c0_0] : memref<16x784xf32, #tpu.memory_space<vmem>>, vector<16x784xf32>
    %1 = arith.truncf %0 : vector<16x784xf32> to vector<16x784xbf16>
    %c0_1 = arith.constant 0 : index
    %c0_2 = arith.constant 0 : index
    %2 = vector.load %arg2[%c0_1, %c0_2] : memref<784x128xbf16, #tpu.memory_space<vmem>>, vector<784x128xbf16>
    %cst = arith.constant dense<0.000000e+00> : vector<16x128xf32>
    %3 = tpu.matmul %1, %2, %cst {dimension_numbers = #tpu.dot_dimension_numbers<[1], [0], [0], [1], [0, 0, 1, 1], [], []>} : vector<16x784xbf16>, vector<784x128xbf16>, vector<16x128xf32> -> vector<16x128xf32>
    %c0_3 = arith.constant 0 : index
    %c0_4 = arith.constant 0 : index
    %4 = vector.load %arg3[%c0_3, %c0_4] : memref<1x128xf32, #tpu.memory_space<vmem>>, vector<1x128xf32>
    %5 = vector.broadcast %4 : vector<1x128xf32> to vector<16x128xf32>
    %6 = arith.addf %3, %5 : vector<16x128xf32>
    %cst_5 = arith.constant 0.000000e+00 : f32
    %7 = vector.broadcast %cst_5 : f32 to vector<16x128xf32>
    %8 = arith.maximumf %6, %7 : vector<16x128xf32>
    %9 = arith.truncf %8 : vector<16x128xf32> to vector<16x128xbf16>
    %c0_6 = arith.constant 0 : index
    %c0_7 = arith.constant 0 : index
    %10 = vector.load %arg4[%c0_6, %c0_7] : memref<128x128xbf16, #tpu.memory_space<vmem>>, vector<128x128xbf16>
    %cst_8 = arith.constant dense<0.000000e+00> : vector<16x128xf32>
    %11 = tpu.matmul %9, %10, %cst_8 {dimension_numbers = #tpu.dot_dimension_numbers<[1], [0], [0], [1], [0, 0, 1, 1], [], []>} : vector<16x128xbf16>, vector<128x128xbf16>, vector<16x128xf32> -> vector<16x128xf32>
    %c0_9 = arith.constant 0 : index
    %c0_10 = arith.constant 0 : index
    %12 = vector.load %arg5[%c0_9, %c0_10] : memref<1x128xf32, #tpu.memory_space<vmem>>, vector<1x128xf32>
    %13 = vector.broadcast %12 : vector<1x128xf32> to vector<16x128xf32>
    %14 = arith.addf %11, %13 : vector<16x128xf32>
    %cst_11 = arith.constant 0.000000e+00 : f32
    %15 = vector.broadcast %cst_11 : f32 to vector<16x128xf32>
    %16 = arith.maximumf %14, %15 : vector<16x128xf32>
    %17 = arith.truncf %16 : vector<16x128xf32> to vector<16x128xbf16>
    %c0_12 = arith.constant 0 : index
    %c0_13 = arith.constant 0 : index
    %18 = vector.load %arg6[%c0_12, %c0_13] : memref<128x128xbf16, #tpu.memory_space<vmem>>, vector<128x128xbf16>
    %cst_14 = arith.constant dense<0.000000e+00> : vector<16x128xf32>
    %19 = tpu.matmul %17, %18, %cst_14 {dimension_numbers = #tpu.dot_dimension_numbers<[1], [0], [0], [1], [0, 0, 1, 1], [], []>} : vector<16x128xbf16>, vector<128x128xbf16>, vector<16x128xf32> -> vector<16x128xf32>
    %c0_15 = arith.constant 0 : index
    %c0_16 = arith.constant 0 : index
    %20 = vector.load %arg7[%c0_15, %c0_16] : memref<1x128xf32, #tpu.memory_space<vmem>>, vector<1x128xf32>
    %21 = vector.broadcast %20 : vector<1x128xf32> to vector<16x128xf32>
    %22 = arith.addf %19, %21 : vector<16x128xf32>
    %cst_17 = arith.constant 0.000000e+00 : f32
    %23 = vector.broadcast %cst_17 : f32 to vector<16x128xf32>
    %24 = arith.maximumf %22, %23 : vector<16x128xf32>
    %25 = arith.truncf %24 : vector<16x128xf32> to vector<16x128xbf16>
    %c0_18 = arith.constant 0 : index
    %c0_19 = arith.constant 0 : index
    %26 = vector.load %arg8[%c0_18, %c0_19] : memref<8x128xbf16, #tpu.memory_space<vmem>>, vector<8x128xbf16>
    %cst_20 = arith.constant dense<0.000000e+00> : vector<8x16xf32>
    %27 = tpu.matmul %26, %25, %cst_20 {dimension_numbers = #tpu.dot_dimension_numbers<[1], [1], [0], [0], [0, 0, 1, 0], [], []>} : vector<8x128xbf16>, vector<16x128xbf16>, vector<8x16xf32> -> vector<8x16xf32>
    %c0_21 = arith.constant 0 : index
    %c0_22 = arith.constant 0 : index
    %28 = vector.load %arg9[%c0_21, %c0_22] : memref<8x1xf32, #tpu.memory_space<vmem>>, vector<8x1xf32>
    %29 = vector.broadcast %28 : vector<8x1xf32> to vector<8x16xf32>
    %30 = arith.addf %27, %29 : vector<8x16xf32>
    %cst_23 = arith.constant 0.000000e+00 : f32
    %31 = vector.broadcast %cst_23 : f32 to vector<8x16xf32>
    %32 = arith.subf %31, %30 : vector<8x16xf32>
    %33 = math.exp %32 : vector<8x16xf32>
    %cst_24 = arith.constant 1.000000e+00 : f32
    %34 = vector.broadcast %cst_24 : f32 to vector<8x16xf32>
    %35 = arith.addf %34, %33 : vector<8x16xf32>
    %36 = tpu.reciprocal %35 : vector<8x16xf32> -> vector<8x16xf32>
    %c0_25 = arith.constant 0 : index
    %c0_26 = arith.constant 0 : index
    %37 = vector.load %arg10[%c0_25, %c0_26] : memref<8x16xf32, #tpu.memory_space<vmem>>, vector<8x16xf32>
    tpu.vector_store %arg10[%c0_25, %c0_26], %36 {strides = array<i32>} : memref<8x16xf32, #tpu.memory_space<vmem>>, vector<8x16xf32>,
    return
  }
  func.func @transform_0(%arg0: i32) -> (i32, i32) {
    %c0_i32 = arith.constant 0 : i32
    %c0_i32_0 = arith.constant 0 : i32
    return %arg0, %c0_i32 : i32, i32
  }
  func.func @transform_1(%arg0: i32) -> (i32, i32) {
    %c0_i32 = arith.constant 0 : i32
    %c0_i32_0 = arith.constant 0 : i32
    %c0_i32_1 = arith.constant 0 : i32
    return %c0_i32, %c0_i32_0 : i32, i32
  }
  func.func @transform_2(%arg0: i32) -> (i32, i32) {
    %c0_i32 = arith.constant 0 : i32
    %c0_i32_0 = arith.constant 0 : i32
    %c0_i32_1 = arith.constant 0 : i32
    return %c0_i32, %c0_i32_0 : i32, i32
  }
  func.func @transform_3(%arg0: i32) -> (i32, i32) {
    %c0_i32 = arith.constant 0 : i32
    %c0_i32_0 = arith.constant 0 : i32
    %c0_i32_1 = arith.constant 0 : i32
    return %c0_i32, %c0_i32_0 : i32, i32
  }
  func.func @transform_4(%arg0: i32) -> (i32, i32) {
    %c0_i32 = arith.constant 0 : i32
    %c0_i32_0 = arith.constant 0 : i32
    %c0_i32_1 = arith.constant 0 : i32
    return %c0_i32, %c0_i32_0 : i32, i32
  }
  func.func @transform_5(%arg0: i32) -> (i32, i32) {
    %c0_i32 = arith.constant 0 : i32
    %c0_i32_0 = arith.constant 0 : i32
    %c0_i32_1 = arith.constant 0 : i32
    return %c0_i32, %c0_i32_0 : i32, i32
  }
  func.func @transform_6(%arg0: i32) -> (i32, i32) {
    %c0_i32 = arith.constant 0 : i32
    %c0_i32_0 = arith.constant 0 : i32
    %c0_i32_1 = arith.constant 0 : i32
    return %c0_i32, %c0_i32_0 : i32, i32
  }
  func.func @transform_7(%arg0: i32) -> (i32, i32) {
    %c0_i32 = arith.constant 0 : i32
    %c0_i32_0 = arith.constant 0 : i32
    %c0_i32_1 = arith.constant 0 : i32
    return %c0_i32, %c0_i32_0 : i32, i32
  }
  func.func @transform_8(%arg0: i32) -> (i32, i32) {
    %c0_i32 = arith.constant 0 : i32
    %c0_i32_0 = arith.constant 0 : i32
    %c0_i32_1 = arith.constant 0 : i32
    return %c0_i32, %c0_i32_0 : i32, i32
  }
  func.func @transform_9(%arg0: i32) -> (i32, i32) {
    %c0_i32 = arith.constant 0 : i32
    %c0_i32_0 = arith.constant 0 : i32
    return %c0_i32, %arg0 : i32, i32
  }
}

</mosaic_0001>

<bundles_post_ra>
// kernel: tpu_custom_call.1
= control target key start
LH: loop header
LB: loop body
LE: loop exit
PB: predicated region body
PF: predicated region fallthrough
CT: control target
= control target key end

     0   :  { %14 = vsyncpa [#allocation3], 0  ;;  %s1508_s0 = inlined_call_operand.hbm [shape: f32[16,784], index: 0, kind: input, shape index: {}]   ;;  %s1509_s1 = inlined_call_operand.hbm [shape: bf16[784,128], index: 1, kind: input, shape index: {}]   ;;  %s1510_s2 = inlined_call_operand.vmem [shape: f32[1,128], index: 2, kind: input, shape index: {}]   ;;  %s1511_s3 = inlined_call_operand.hbm [shape: bf16[128,128], index: 3, kind: input, shape index: {}]   ;;  %s1512_s4 = inlined_call_operand.vmem [shape: f32[1,128], index: 4, kind: input, shape index: {}]   ;;  %s1513_s5 = inlined_call_operand.hbm [shape: bf16[128,128], index: 5, kind: input, shape index: {}]   ;;  %s1514_s6 = inlined_call_operand.vmem [shape: f32[1,128], index: 6, kind: input, shape index: {}]   ;;  %s1515_s7 = inlined_call_operand.vmem [shape: bf16[8,128], index: 7, kind: input, shape index: {}]   ;;  %s1516_s8 = inlined_call_operand.vmem [shape: f32[8,1], index: 8, kind: input, shape index: {}]   ;;  %s1517_s9 = inlined_call_operand.hbm [shape: f32[8,16], index: 9, kind: output, shape index: {}]  }
   0x1   :  { %15 = vsyncpa [#allocation6], 0 }
   0x2   :  { %16 = vsyncpa [#allocation9], 0 }
   0x3   :  { %17 = vsyncpa [#allocation4], 0  ;;  %s1379_s30 = smov [#allocation5]  }
   0x4   :  { %s35_s10 = sshll.u32 %s1379_s30, 4  ;;  %s36_s10 = int_to_ptr.vmem [resolvable:$true] %s35_s10 }
   0x5   :  { %s1279_s11 = scalar_lea.vmem %s36_s10, 6272  ;;  %p1284_p1 = scmp.lt.s32.totalorder %s36_s10, %s36_s10 }
   0x6   :  { %p1280_p0 = scmp.ne.s32.totalorder %s36_s10, %s1279_s11  ;;  %p1285_p2 = scmp.lt.s32.totalorder %s1279_s11, %s1279_s11 }
   0x8   :  { %p1286_p3 = por %p1285_p2, %p1284_p1 }
   0xa   :  { %p1287_p4 = pnand %p1286_p3, %p1280_p0 }
   0xc   :  { %1290 = shalt.err (!%p1287_p4)
}
   0xd   :  { %s1380_s12 = smov 64   ;;  %s1381_s13 = smov 4  }
   0xe   :  { %41 = dma.hbm_to_vmem [thread:$0]  %s1509_s1, 6272, %s36_s10, [#allocation6], %s1380_s12, %s1380_s12, %s1381_s13  }
   0xf   :  { %s1382_s16 = smov [#allocation2]  }
  0x10   :  { %s23_s17 = sshll.u32 %s1382_s16, 4  ;;  %s24_s17 = int_to_ptr.vmem [resolvable:$true] %s23_s17 }
  0x11   :  { %s1299_s18 = scalar_lea.vmem %s24_s17, 1792  ;;  %p1304_p6 = scmp.lt.s32.totalorder %s24_s17, %s24_s17 }
  0x12   :  { %p1300_p5 = scmp.ne.s32.totalorder %s24_s17, %s1299_s18  ;;  %p1305_p7 = scmp.lt.s32.totalorder %s1299_s18, %s1299_s18 }
  0x14   :  { %p1306_p8 = por %p1305_p7, %p1304_p6 }
  0x16   :  { %p1307_p9 = pnand %p1306_p8, %p1300_p5 }
  0x18   :  { %1310 = shalt.err (!%p1307_p9)
}
  0x19   :  { %s1383_s19 = smov 896   ;;  %s1384_s20 = smov 56  }
  0x1a   :  { %29 = dma.hbm_to_vmem [thread:$0]  %s1508_s0, 1792, %s24_s17, [#allocation3], %s1383_s19, %s1383_s19, %s1384_s20  }
  0x1b   :  { %s1385_s23 = smov [#allocation7]   ;;  %s1386_s25 = smov [#allocation8]  }
  0x1c   :  { %s49_s24 = sshll.u32 %s1385_s23, 4  ;;  %s63_s1 = sshll.u32 %s1386_s25, 4  ;;  %s50_s24 = int_to_ptr.vmem [resolvable:$true] %s49_s24  ;;  %s64_s1 = int_to_ptr.vmem [resolvable:$true] %s63_s1 }
  0x1d   :  { %s1319_s26 = scalar_lea.vmem %s50_s24, 1024  ;;  %p1324_p11 = scmp.lt.s32.totalorder %s50_s24, %s50_s24 }
  0x1e   :  { %p1320_p10 = scmp.ne.s32.totalorder %s50_s24, %s1319_s26  ;;  %p1325_p12 = scmp.lt.s32.totalorder %s1319_s26, %s1319_s26 }
  0x20   :  { %p1326_p13 = por %p1325_p12, %p1324_p11 }
  0x22   :  { %p1327_p0 = pnand %p1326_p13, %p1320_p10 }
  0x24   :  { %1330 = shalt.err (!%p1327_p0)
}
  0x25   :  { %55 = dma.hbm_to_vmem [thread:$0]  %s1511_s3, 1024, %s50_s24, [#allocation6], %s1380_s12, %s1380_s12, %s1381_s13  }
  0x26   :  { %s1339_s0 = scalar_lea.vmem %s64_s1, 1024  ;;  %p1344_p2 = scmp.lt.s32.totalorder %s64_s1, %s64_s1 }
  0x27   :  { %p1340_p1 = scmp.ne.s32.totalorder %s64_s1, %s1339_s0  ;;  %p1345_p3 = scmp.lt.s32.totalorder %s1339_s0, %s1339_s0 }
  0x29   :  { %p1346_p4 = por %p1345_p3, %p1344_p2 }
  0x2b   :  { %p1347_p5 = pnand %p1346_p4, %p1340_p1 }
  0x2d   :  { %1350 = shalt.err (!%p1347_p5)
}
  0x2e   :  { %69 = dma.hbm_to_vmem [thread:$0]  %s1513_s5, 1024, %s64_s1, [#allocation9], %s1380_s12, %s1380_s12, %s1381_s13  }
  0x2f   :  { %1371 = dma.done.wait [#allocation3], 1792  }
  0x30   :  { %1372 = vsyncadd [#allocation3], 4294965504 }
  0x31   :  { %1373 = dma.done.wait [#allocation6], 7296  }
  0x32   :  { %1374 = vsyncadd [#allocation6], 4294960000 }
  0x33   :  { %1375 = dma.done.wait [#allocation9], 1024  }
  0x34   :  { %1376 = vsyncadd [#allocation9], 4294966272  ;;  %v1202_v0 = vld [vmem:[#allocation5 + $0x78] sm:$0xff]   ;;  %v1206_v4 = vld [vmem:[#allocation5 + $0x70] sm:$0xff]   ;;  %v1387_v43 = vmov 0.0   ;;  %vm1388_vm0 = vmmov 0  }
  0x35   :  { %v1203_v1 = vld [vmem:[#allocation5 + $0x38] sm:$0xff]   ;;  %1049 = vmatprep.subr.bf16.mxu0 %v1202_v0  ;;  %v1207_v5 = vld [vmem:[#allocation5 + $0x30] sm:$0xff]   ;;  %v1210_v8 = vld [vmem:[#allocation5 + $0x68] sm:$0xff]   ;;  %vm509_vm1 = vcmask 130048  }
  0x36   :  { %v1204_v2 = vld [vmem:[#allocation5 + $0xf8] sm:$0xff]   ;;  %1050 = vmatpush3.bf16.msra.mxu0 %v1203_v1  ;;  %v1208_v6 = vld [vmem:[#allocation5 + $0xf0] sm:$0xff]   ;;  %v1211_v9 = vld [vmem:[#allocation5 + $0x28] sm:$0xff]  }
  0x37   :  { %v1205_v3 = vld [vmem:[#allocation5 + $0xb8] sm:$0xff]   ;;  %1071 = vmatprep.subr.bf16.mxu1 %v1204_v2  ;;  %1051 = vmatprep.subr.bf16.mxu0 %v1206_v4  ;;  %v1209_v7 = vld [vmem:[#allocation5 + $0xb0] sm:$0xff]   ;;  %v1212_v10 = vld [vmem:[#allocation5 + $0xe8] sm:$0xff]  }
  0x38   :  { %1072 = vmatpush3.bf16.msra.mxu1 %v1205_v3  ;;  %v1213_v11 = vld [vmem:[#allocation5 + $0xa8] sm:$0xff]   ;;  %v1214_v12 = vld [vmem:[#allocation5 + $0x60] sm:$0xff]   ;;  %v1218_v16 = vld [vmem:[#allocation5 + $0x58] sm:$0xff]  }
  0x39   :  { %1073 = vmatprep.subr.bf16.mxu1 %v1208_v6  ;;  %v1215_v13 = vld [vmem:[#allocation5 + $0x20] sm:$0xff]   ;;  %v1219_v17 = vld [vmem:[#allocation5 + $0x18] sm:$0xff]   ;;  %v1222_v20 = vld [vmem:[#allocation5 + $0x50] sm:$0xff]  }
  0x3a   :  { %1052 = vmatpush3.bf16.msra.mxu0 %v1207_v5  ;;  %v1216_v14 = vld [vmem:[#allocation5 + $0xe0] sm:$0xff]   ;;  %v1220_v18 = vld [vmem:[#allocation5 + $0xd8] sm:$0xff]   ;;  %v1223_v21 = vld [vmem:[#allocation5 + $0x10] sm:$0xff]  }
  0x3b   :  { %1053 = vmatprep.subr.bf16.mxu0 %v1210_v8  ;;  %v1217_v15 = vld [vmem:[#allocation5 + $0xa0] sm:$0xff]   ;;  %v1221_v19 = vld [vmem:[#allocation5 + $0x98] sm:$0xff]   ;;  %v1224_v22 = vld [vmem:[#allocation5 + $0xd0] sm:$0xff]  }
  0x3c   :  { %1074 = vmatpush3.bf16.msra.mxu1 %v1209_v7  ;;  %v1225_v23 = vld [vmem:[#allocation5 + $0x90] sm:$0xff]   ;;  %v1226_v24 = vld [vmem:[#allocation5 + $0x48] sm:$0xff]   ;;  %v1230_v28 = vld [vmem:[#allocation5 + $0x40] sm:$0xff]  }
  0x3d   :  { %1075 = vmatprep.subr.bf16.mxu1 %v1212_v10  ;;  %v1227_v25 = vld [vmem:[#allocation5 + $0x8] sm:$0xff]   ;;  %v1231_v29 = vld [vmem:[#allocation5] sm:$0xff]   ;;  %v90_v31 = vld [vmem:[#allocation2 + $0x8] sm:$0xff] }
  0x3e   :  { %1054 = vmatpush3.bf16.msra.mxu0 %v1211_v9  ;;  %v1228_v26 = vld [vmem:[#allocation5 + $0xc8] sm:$0xff]   ;;  %v1232_v30 = vld [vmem:[#allocation5 + $0xc0] sm:$0xff]   ;;  %v97_v32 = vld [vmem:[#allocation2 + $0x40] sm:$0xff] }
  0x3f   :  { %1055 = vmatprep.subr.bf16.mxu0 %v1214_v12  ;;  %v1229_v27 = vld [vmem:[#allocation5 + $0x88] sm:$0xff]   ;;  %v104_v33 = vpack.c.bf16 %v97_v32, %v90_v31  ;;  %v1233_v34 = vld [vmem:[#allocation5 + $0x80] sm:$0xff]   ;;  %v89_v35 = vld [vmem:[#allocation2] sm:$0xff] }
  0x40   :  { %1076 = vmatpush3.bf16.msra.mxu1 %v1213_v11  ;;  %v96_v36 = vld [vmem:[#allocation2 + $0x38] sm:$0xff]  ;;  %v1234_v38 = vld [vmem:[#allocation5 + $0x178] sm:$0xff]   ;;  %v99_v40 = vld [vmem:[#allocation2 + $0x50] sm:$0xff] }
  0x41   :  { %1077 = vmatprep.subr.bf16.mxu1 %v1216_v14  ;;  %545 = vmatprep.mubr.bf16.mxu0 %v104_v33  ;;  %v103_v37 = vpack.c.bf16 %v96_v36, %v89_v35  ;;  %v92_v39 = vld [vmem:[#allocation2 + $0x18] sm:$0xff]  ;;  %v1235_v42 = vld [vmem:[#allocation5 + $0x138] sm:$0xff]   ;;  %v91_v44 = vld [vmem:[#allocation2 + $0x10] sm:$0xff] }
  0x42   :  { %1056 = vmatpush3.bf16.msra.mxu0 %v1215_v13  ;;  %v106_v41 = vpack.c.bf16 %v99_v40, %v92_v39  ;;  %v98_v45 = vld [vmem:[#allocation2 + $0x48] sm:$0xff]  ;;  %v1236_v47 = vld [vmem:[#allocation5 + $0x170] sm:$0xff]   ;;  %v1238_v49 = vld [vmem:[#allocation5 + $0x168] sm:$0xff]  }
  0x43   :  { %1057 = vmatprep.subr.bf16.mxu0 %v1218_v16  ;;  %v105_v46 = vpack.c.bf16 %v98_v45, %v91_v44  ;;  %v1237_v48 = vld [vmem:[#allocation5 + $0x130] sm:$0xff]   ;;  %v1239_v50 = vld [vmem:[#allocation5 + $0x128] sm:$0xff]   ;;  %v1240_v51 = vld [vmem:[#allocation5 + $0x160] sm:$0xff]  }
  0x44   :  { %1078 = vmatpush3.bf16.msra.mxu1 %v1217_v15  ;;  %586 = vmatprep.mubr.bf16.mxu1 %v106_v41  ;;  %v1241_v52 = vld [vmem:[#allocation5 + $0x120] sm:$0xff]   ;;  %v1242_v53 = vld [vmem:[#allocation5 + $0x158] sm:$0xff]   ;;  %v1244_v55 = vld [vmem:[#allocation5 + $0x150] sm:$0xff]  }
  0x45   :  { %1079 = vmatprep.subr.bf16.mxu1 %v1220_v18  ;;  %v1243_v54 = vld [vmem:[#allocation5 + $0x118] sm:$0xff]   ;;  %v1250_v56 = vld [vmem:[#allocation5 + $0x180] sm:$0xff]   ;;  %v1245_v58 = vld [vmem:[#allocation5 + $0x110] sm:$0xff]  }
  0x46   :  { %1058 = vmatpush3.bf16.msra.mxu0 %v1219_v17  ;;  %v94_v57 = vld [vmem:[#allocation2 + $0x28] sm:$0xff]  ;;  %v1246_v59 = vld [vmem:[#allocation5 + $0x148] sm:$0xff]   ;;  %v101_v60 = vld [vmem:[#allocation2 + $0x60] sm:$0xff] }
  0x47   :  { %1059 = vmatprep.subr.bf16.mxu0 %v1222_v20  ;;  %v108_v61 = vpack.c.bf16 %v101_v60, %v94_v57  ;;  %v95_v62 = vld [vmem:[#allocation2 + $0x30] sm:$0xff]  ;;  %v102_v63 = vld [vmem:[#allocation2 + $0x68] sm:$0xff]  ;;  %v1247_v1 = vld [vmem:[#allocation5 + $0x108] sm:$0xff]  }
  0x48   :  { %1080 = vmatpush3.bf16.msra.mxu1 %v1221_v19  ;;  %v109_v0 = vpack.c.bf16 %v102_v63, %v95_v62  ;;  %v1248_v2 = vld [vmem:[#allocation5 + $0x140] sm:$0xff]   ;;  %v93_v4 = vld [vmem:[#allocation2 + $0x20] sm:$0xff]  ;;  %v100_v5 = vld [vmem:[#allocation2 + $0x58] sm:$0xff] }
  0x49   :  { %1081 = vmatprep.subr.bf16.mxu1 %v1224_v22  ;;  %v1249_v3 = vld [vmem:[#allocation5 + $0x100] sm:$0xff]   ;;  %v107_v6 = vpack.c.bf16 %v100_v5, %v93_v4  ;;  %v1252_v8 = vld [vmem:[#allocation7 + $0x30] sm:$0xff]   ;;  %v1253_v9 = vld [vmem:[#allocation7 + $0x28] sm:$0xff]   ;;  %v1389_v4 = vmov 0  }
  0x4a   :  { %1060 = vmatpush3.bf16.msra.mxu0 %v1223_v21  ;;  %v1251_v7 = vld [vmem:[#allocation7 + $0x38] sm:$0xff]   ;;  %v1254_v10 = vld [vmem:[#allocation7 + $0x20] sm:$0xff]   ;;  %v1256_v12 = vld [vmem:[#allocation7 + $0x10] sm:$0xff]   ;;  %1201 = vset.pattern.permute.xlu0 %v1389_v4 }
  0x4b   :  { %1061 = vmatprep.subr.bf16.mxu0 %v1226_v24  ;;  %v1255_v11 = vld [vmem:[#allocation7 + $0x18] sm:$0xff]   ;;  %v1257_v13 = vld [vmem:[#allocation7 + $0x8] sm:$0xff]   ;;  %v1258_v14 = vld [vmem:[#allocation7] sm:$0xff]  }
  0x4c   :  { %1082 = vmatpush3.bf16.msra.mxu1 %v1225_v23  ;;  %v1259_v15 = vld [vmem:[#allocation8 + $0x38] sm:$0xff]   ;;  %v1260_v16 = vld [vmem:[#allocation8 + $0x30] sm:$0xff]   ;;  %v1261_v17 = vld [vmem:[#allocation8 + $0x28] sm:$0xff]  }
  0x4d   :  { %1083 = vmatprep.subr.bf16.mxu1 %v1228_v26  ;;  %v1262_v18 = vld [vmem:[#allocation8 + $0x20] sm:$0xff]   ;;  %v1263_v19 = vld [vmem:[#allocation8 + $0x18] sm:$0xff]   ;;  %v980_v32 = vld [vmem:[%s1510_s2] ss:$0 sm:$0xff] }
  0x4e   :  { %1062 = vmatpush3.bf16.msra.mxu0 %v1227_v25  ;;  %v1266_v57 = vld [vmem:[#allocation8] sm:$0xff]   ;;  %v1040_v5 = vld [vmem:[%s1514_s6] ss:$0 sm:$0xff]  ;;  %s1390_s6 = smov [#allocation10]  }
  0x4f   :  { %1063 = vmatprep.subr.bf16.mxu0 %v1230_v28 }
  0x50   :  { %1084 = vmatpush3.bf16.msra.mxu1 %v1229_v27 }
  0x51   :  { %1085 = vmatprep.subr.bf16.mxu1 %v1232_v30 }
  0x52   :  { %1064 = vmatpush3.bf16.msra.mxu0 %v1231_v29 }
  0x53   :  { %1093 = vmatprep.subr.bf16.mxu0 %v1234_v38 }
  0x54   :  { %1086 = vmatpush3.bf16.msra.mxu1 %v1233_v34 }
  0x55   :  { %1137 = vmatprep.subr.bf16.mxu1 %v1387_v43  ;;  %546 = vmatmul.mubr.bf16.vlgmr.msra.gmra.mxu0 %v103_v37 }
  0x56   :  { %1094 = vmatpush3.bf16.msra.mxu0 %v1235_v42  ;;  %627 = vmatprep.mubr.bf16.mxu0 %v108_v61 }
  0x57   :  { %587 = vmatmul.mubr.bf16.vlgmr.msra.gmra.mxu1 %v105_v46  ;;  %1095 = vmatprep.subr.bf16.mxu0 %v1236_v47 }
  0x58   :  { %1139 = vmatprep.mubr.msk.bf16.mxu1 %vm1388_vm0, %v1387_v43  ;;  %1138 = vmatpush3.bf16.msra.mxu1 %v1250_v56  ;;  %v1265_v56 = vld [vmem:[#allocation8 + $0x8] sm:$0xff]  }
  0x59   :  { %1143 = vmatprep.subr.bf16.mxu1 %v1387_v43 }
  0x5a   :  { %1096 = vmatpush3.bf16.msra.mxu0 %v1237_v48 }
  0x5b   :  { %1097 = vmatprep.subr.bf16.mxu0 %v1238_v49 }
  0x5e   :  { %1098 = vmatpush3.bf16.msra.mxu0 %v1239_v50 }
  0x5f   :  { %1099 = vmatprep.subr.bf16.mxu0 %v1240_v51  ;;  %1140 = vmatmul.mubr.msk.bf16.vlgmr.msra.gmra.mxu1 %vm509_vm1, %v109_v0 }
  0x60   :  { %1159 = vmatprep.mubr.msk.bf16.mxu1 %vm1388_vm0, %v1387_v43  ;;  %1144 = vmatpush3.bf16.msra.mxu1 %v1251_v7 }
  0x61   :  { %1145 = vmatprep.subr.bf16.mxu1 %v1387_v43 }
  0x62   :  { %1100 = vmatpush3.bf16.msra.mxu0 %v1241_v52 }
  0x63   :  { %1101 = vmatprep.subr.bf16.mxu0 %v1242_v53 }
  0x64   :  { %1146 = vmatpush3.bf16.msra.mxu1 %v1252_v8 }
  0x65   :  { %1147 = vmatprep.subr.bf16.mxu1 %v1387_v43 }
  0x66   :  { %1102 = vmatpush3.bf16.msra.mxu0 %v1243_v54 }
  0x67   :  { %1103 = vmatprep.subr.bf16.mxu0 %v1244_v55  ;;  %v1264_v55 = vld [vmem:[#allocation8 + $0x10] sm:$0xff]  }
  0x68   :  { %1148 = vmatpush3.bf16.msra.mxu1 %v1253_v9 }
  0x69   :  { %1149 = vmatprep.subr.bf16.mxu1 %v1387_v43 }
  0x6a   :  { %1104 = vmatpush3.bf16.msra.mxu0 %v1245_v58  ;;  %v1031_v58 = vld [vmem:[%s1512_s4] ss:$0 sm:$0xff] }
  0x6b   :  { %1105 = vmatprep.subr.bf16.mxu0 %v1246_v59 }
  0x6c   :  { %1150 = vmatpush3.bf16.msra.mxu1 %v1254_v10 }
  0x6d   :  { %1151 = vmatprep.subr.bf16.mxu1 %v1387_v43 }
  0x6e   :  { %1106 = vmatpush3.bf16.msra.mxu0 %v1247_v1 }
  0x6f   :  { %1107 = vmatprep.subr.bf16.mxu0 %v1248_v2 }
  0x70   :  { %1152 = vmatpush3.bf16.msra.mxu1 %v1255_v11 }
  0x71   :  { %1153 = vmatprep.subr.bf16.mxu1 %v1387_v43 }
  0x72   :  { %1108 = vmatpush3.bf16.msra.mxu0 %v1249_v3 }
  0x73   :  { %1163 = vmatprep.subr.bf16.mxu0 %v1387_v43 }
  0x74   :  { %1154 = vmatpush3.bf16.msra.mxu1 %v1256_v12 }
  0x75   :  { %628 = vmatmul.mubr.bf16.vlgmr.msra.gmra.mxu0 %v107_v6  ;;  %1155 = vmatprep.subr.bf16.mxu1 %v1387_v43 }
  0x76   :  { %1179 = vmatprep.mubr.msk.bf16.mxu0 %vm1388_vm0, %v1387_v43  ;;  %1164 = vmatpush3.bf16.msra.mxu0 %v1259_v15  ;;  %v910_v15 = vld [vmem:[%s1515_s7] sm:$0xf] }
  0x77   :  { %1165 = vmatprep.subr.bf16.mxu0 %v1387_v43 }
  0x78   :  { %1156 = vmatpush3.bf16.msra.mxu1 %v1257_v13 }
  0x79   :  { %1157 = vmatprep.subr.bf16.mxu1 %v1387_v43 }
  0x7a   :  { %1166 = vmatpush3.bf16.msra.mxu0 %v1260_v16 }
  0x7b   :  { %1167 = vmatprep.subr.bf16.mxu0 %v1387_v43 }
  0x7c   :  { %1158 = vmatpush3.bf16.msra.mxu1 %v1258_v14 }
  0x7d   :  { %1183 = vmatprep.subr.bf16.mxu1 %v1387_v43 }
  0x7e   :  { %1168 = vmatpush3.bf16.msra.mxu0 %v1261_v17 }
  0x7f   :  { %1169 = vmatprep.subr.bf16.mxu0 %v1387_v43 }
  0x82   :  { %1170 = vmatpush3.bf16.msra.mxu0 %v1262_v18 }
  0x83   :  { %1171 = vmatprep.subr.bf16.mxu0 %v1387_v43 }
  0x86   :  { %1172 = vmatpush3.bf16.msra.mxu0 %v1263_v19 }
  0x87   :  { %1173 = vmatprep.subr.bf16.mxu0 %v1387_v43 }
  0x8a   :  { %1174 = vmatpush3.bf16.msra.mxu0 %v1264_v55 }
  0x8b   :  { %1175 = vmatprep.subr.bf16.mxu0 %v1387_v43 }
  0x8e   :  { %1176 = vmatpush3.bf16.msra.mxu0 %v1265_v56 }
  0x8f   :  { %1177 = vmatprep.subr.bf16.mxu0 %v1387_v43 }
  0x92   :  { %1178 = vmatpush3.bf16.msra.mxu0 %v1266_v57 }
 0x115   :  { %v1065_v23 = vpop.f32.mrf.mxu0 }
 0x117   :  { %v1087_v20 = vpop.f32.mrf.mxu1  ;;  %v1066_v25 = vpop.f32.mrf.mxu0 }
 0x118   :  { %v1067_v31 = vadd.f32 %v1066_v25, %v1065_v23 }
 0x119   :  { %v1088_v21 = vpop.f32.mrf.mxu1  ;;  %v1068_v28 = vpop.f32.mrf.mxu0 }
 0x11a   :  { %v548_v34 = vadd.f32 %v1067_v31, %v980_v32  ;;  %v1089_v35 = vadd.f32 %v1088_v21, %v1087_v20 }
 0x11b   :  { %v1090_v22 = vpop.f32.mrf.mxu1  ;;  %v1069_v33 = vpop.f32.mrf.mxu0 }
 0x11c   :  { %v1070_v36 = vadd.f32 %v1069_v33, %v1068_v28  ;;  %v589_v39 = vadd.f32 %v1089_v35, %v548_v34 }
 0x11d   :  { %v1091_v24 = vpop.f32.mrf.mxu1 }
 0x11e   :  { %v551_v40 = vadd.f32 %v1070_v36, %v980_v32  ;;  %v1092_v41 = vadd.f32 %v1091_v24, %v1090_v22 }
 0x11f   :  { %v670_v26 = vpop.f32.mrf.mxu1 }
 0x120   :  { %v592_v47 = vadd.f32 %v1092_v41, %v551_v40 }
 0x121   :  { %v1141_v27 = vpop.f32.mrf.mxu1 }
 0x123   :  { %v673_v29 = vpop.f32.mrf.mxu1 }
 0x125   :  { %v1142_v30 = vpop.f32.mrf.mxu1 }
 0x135   :  { %v1109_v37 = vpop.f32.mrf.mxu0 }
 0x137   :  { %v1110_v38 = vpop.f32.mrf.mxu0 }
 0x138   :  { %v1111_v42 = vadd.f32 %v1110_v38, %v1109_v37 }
 0x139   :  { %v1112_v44 = vpop.f32.mrf.mxu0 }
 0x13a   :  { %v630_v45 = vadd.f32 %v1111_v42, %v589_v39 }
 0x13b   :  { %v1113_v46 = vpop.f32.mrf.mxu0 }
 0x13c   :  { %v1114_v48 = vadd.f32 %v1113_v46, %v1112_v44  ;;  %v671_v49 = vadd.f32 %v670_v26, %v630_v45 }
 0x13e   :  { %v633_v50 = vadd.f32 %v1114_v48, %v592_v47  ;;  %v677_v52 = vmax.f32 %v671_v49, 0.0 }
 0x140   :  { %v674_v51 = vadd.f32 %v673_v29, %v633_v50 }
 0x142   :  { %v678_v53 = vmax.f32 %v674_v51, 0.0 }
 0x144   :  { %v679_v54 = vpack.c.bf16 %v678_v53, %v677_v52 }
 0x146   :  { %1160 = vmatmul.mubr.bf16.vlgmr.msra.gmra.mxu1 %v679_v54 }
 0x147   :  { %1185 = vmatprep.mubr.msk.bf16.mxu1 %vm1388_vm0, %v1387_v43  ;;  %v911_v43 = vld [vmem:[%s1516_s8] sm:$0xff]  ;;  %s969_s8 = sshll.u32 %s1390_s6, 4  ;;  %s970_s8 = int_to_ptr.vmem [resolvable:$true] %s969_s8 }
 0x148   :  { %914 = vperm.xlu0 %1201, %v911_v43   ;;  %s1351_s7 = scalar_lea.vmem %s970_s8, 128  ;;  %p1356_p7 = scmp.lt.s32.totalorder %s970_s8, %s970_s8 }
 0x149   :  { %p1352_p6 = scmp.ne.s32.totalorder %s970_s8, %s1351_s7  ;;  %p1357_p8 = scmp.lt.s32.totalorder %s1351_s7, %s1351_s7 }
 0x14b   :  { %p1358_p9 = por %p1357_p8, %p1356_p7 }
 0x14d   :  { %p1359_p10 = pnand %p1358_p9, %p1352_p6 }
 0x1c3   :  { %v915_v16 = vpop.permute.xlu0 %914 }
 0x206   :  { %v785_v59 = vpop.f32.mrf.mxu1 }
 0x207   :  { %v786_v61 = vadd.f32 %v1031_v58, %v785_v59 }
 0x208   :  { %v1161_v60 = vpop.f32.mrf.mxu1 }
 0x209   :  { %v792_v1 = vmax.f32 %v786_v61, 0.0 }
 0x20a   :  { %v788_v62 = vpop.f32.mrf.mxu1 }
 0x20b   :  { %v789_v63 = vadd.f32 %v1031_v58, %v788_v62 }
 0x20c   :  { %v1162_v0 = vpop.f32.mrf.mxu1 }
 0x20d   :  { %v793_v2 = vmax.f32 %v789_v63, 0.0 }
 0x20f   :  { %v794_v3 = vpack.c.bf16 %v793_v2, %v792_v1 }
 0x211   :  { %1180 = vmatmul.mubr.bf16.vlgmr.msra.gmra.mxu0 %v794_v3 }
 0x2d1   :  { %v900_v6 = vpop.f32.mrf.mxu0 }
 0x2d2   :  { %v901_v8 = vadd.f32 %v1040_v5, %v900_v6 }
 0x2d3   :  { %v1181_v7 = vpop.f32.mrf.mxu0 }
 0x2d4   :  { %v907_v12 = vmax.f32 %v901_v8, 0.0 }
 0x2d5   :  { %v903_v9 = vpop.f32.mrf.mxu0 }
 0x2d6   :  { %v904_v10 = vadd.f32 %v1040_v5, %v903_v9 }
 0x2d7   :  { %v1182_v11 = vpop.f32.mrf.mxu0 }
 0x2d8   :  { %v908_v13 = vmax.f32 %v904_v10, 0.0 }
 0x2da   :  { %v909_v14 = vpack.c.bf16 %v908_v13, %v907_v12 }
 0x2dc   :  { %1184 = vmatpush3.bf16.xpose.msra.mxu1 %v909_v14 }
 0x2e3   :  { %1186 = vmatmul.mubr.bf16.vlgmr.msra.gmra.mxu1 %v910_v15 }
 0x3a3   :  { %v951_v17 = vpop.f32.mrf.mxu1 }
 0x3a4   :  { %v952_v18 = vadd.f32 %v951_v17, %v915_v16 }
 0x3a5   :  { %v1187_v19 = vpop.f32.mrf.mxu1 }
 0x3a6   :  { %v957_v20 = vsub.f32 0.0, %v952_v18 }
 0x3a7   :  { %v954_v21 = vpop.f32.mrf.mxu1 }
 0x3a8   :  { %v958_v22 = vmul.f32 1.442695, %v957_v20 }
 0x3a9   :  { %v1188_v23 = vpop.f32.mrf.mxu1 }
 0x3aa   :  { %1267 = vpow2.f32 %v958_v22 }
 0x3b7   :  { %v1268_v24 = vpop.eup %1267 }
 0x3b8   :  { %v960_v25 = vadd.f32 1.0, %v1268_v24 }
 0x3ba   :  { %1269 = vrcp.f32 %v960_v25 }
 0x3c7   :  { %v1270_v26 = vpop.eup %1269 }
 0x3c8   :  { %962 = vst.msk [vmem:[#allocation10] sm:$0xff] %vm509_vm1, %v1270_v26 }
 0x3c9   :  { %1362 = shalt.err (!%p1359_p10)
}
 0x3ca   :  { %972 = dma.vmem_to_hbm [thread:$0]  %s970_s8, 128, %s1517_s9, [#allocation4]  }
 0x3cb   :  { %1377 = dma.done.wait [#allocation4], 128  }
 0x3cc   :  { %1378 = vsyncadd [#allocation4], 4294967168 }
 0x3cd   :  { %976 = vsyncpa [#allocation3], 1 }
 0x3ce   :  { %977 = vsyncpa [#allocation6], 1 }
 0x3cf   :  { %978 = vsyncpa [#allocation9], 1 }
 0x3d0   :  { %979 = vsyncpa [#allocation4], 1 }

</bundles_post_ra>
